<compile_context>
chip_gen: v6e
topology: v6e:2x2x1
jax: 0.10.0
libtpu: 0.0.40
codegen_flags: <defaults>
</compile_context>

<pallas_src>
import functools

import jax
import jax.numpy as jnp
from jax.experimental import pallas as pl
from jax.experimental.pallas import tpu as pltpu

GAMMA = 2.0  # module default


def _round_up(x, m):
    return ((x + m - 1) // m) * m


def focal_loss_kernel(logits_ref, targets_ref, alpha_ref, out_ref, acc_ref,
                      *, n_total, tile_n, gamma, size_average):
    pid = pl.program_id(0)

    @pl.when(pid == 0)
    def _init():
        acc_ref[...] = jnp.zeros_like(acc_ref)

    x = logits_ref[...].astype(jnp.float32)           # (tile_n, C)
    t = targets_ref[...]                              # (tile_n, 1) int32
    a = alpha_ref[...].astype(jnp.float32)            # (1, C)
    tn, c = x.shape

    # One-hot target mask via iota == target (scatter-free).
    col = jax.lax.broadcasted_iota(jnp.int32, (tn, c), 1)
    mask = (col == t).astype(jnp.float32)             # (tile_n, C)

    # Numerically-stable log-prob of the target class: log_p = x_t - logsumexp(x)
    m = jnp.max(x, axis=1, keepdims=True)             # (tile_n, 1)
    sum_e = jnp.sum(jnp.exp(x - m), axis=1, keepdims=True)
    lse = m + jnp.log(sum_e)
    x_t = jnp.sum(x * mask, axis=1, keepdims=True)
    log_p = x_t - lse                                 # (tile_n, 1)
    probs = jnp.exp(log_p)                            # (tile_n, 1)

    # alpha[target] gather via the same one-hot mask.
    alpha_s = jnp.sum(a * mask, axis=1, keepdims=True)

    d = 1.0 - probs
    if gamma == 2.0:
        focal = d * d                                 # plain VALU, no transcendental
    else:
        focal = jnp.power(jnp.maximum(d, 0.0), gamma)
    per_row = -alpha_s * focal * log_p                # (tile_n, 1)

    # Mask rows past the true batch size (ragged final tile reads undefined data).
    row = jax.lax.broadcasted_iota(jnp.int32, (tn, 1), 0) + pid * tile_n
    per_row = jnp.where(row < n_total, per_row, 0.0)

    acc_ref[...] += jnp.sum(per_row, axis=0, keepdims=True)   # (1, 1) running sum

    @pl.when(pid == pl.num_programs(0) - 1)
    def _finalize():
        total = acc_ref[...]
        if size_average:
            total = total / jnp.float32(n_total)
        out_ref[...] = total


def focal_loss(logits, targets, alpha=None, gamma=GAMMA, size_average=True,
               tile_n_max=512):
    """logits: (N, C) float; targets: (N,) int; alpha: (C,) float or None. Returns scalar f32."""
    n, c = logits.shape
    targets2d = targets.reshape(n, 1).astype(jnp.int32)
    if alpha is None:
        alpha = jnp.ones((c,), dtype=jnp.float32)     # module default torch.ones(class_num, 1)
    alpha_row = alpha.reshape(1, c).astype(jnp.float32)

    # Batch tile: big enough to approach the HBM roofline, small enough that the
    # double-buffered logits block stays well inside scoped VMEM on all generations.
    bytes_per_row = max(c, 1) * 4
    vmem_budget = 4 * 1024 * 1024                     # per logits buffer (x2 for double-buffer)
    tile_n = min(tile_n_max, max(8, (vmem_budget // bytes_per_row) // 8 * 8))
    tile_n = min(tile_n, _round_up(n, 8))
    grid = pl.cdiv(n, tile_n)

    kernel = functools.partial(
        focal_loss_kernel,
        n_total=n, tile_n=tile_n, gamma=float(gamma), size_average=size_average,
    )

    out = pl.pallas_call(
        kernel,
        out_shape=jax.ShapeDtypeStruct((1, 1), jnp.float32),
        grid_spec=pltpu.PrefetchScalarGridSpec(
            num_scalar_prefetch=0,
            grid=(grid,),
            in_specs=[
                pl.BlockSpec((tile_n, c), lambda i: (i, 0)),   # logits tile
                pl.BlockSpec((tile_n, 1), lambda i: (i, 0)),   # targets tile
                pl.BlockSpec((1, c), lambda i: (0, 0)),        # alpha row (resident)
            ],
            out_specs=pl.BlockSpec((1, 1), lambda i: (0, 0)),  # scalar, written once at finalize
            scratch_shapes=[pltpu.VMEM((1, 1), jnp.float32)],  # running-sum accumulator
        ),
        compiler_params=pltpu.CompilerParams(
            dimension_semantics=("arbitrary",),                # batch axis is a reduction
            vmem_limit_bytes=32 * 1024 * 1024,
        ),
    )(logits.astype(jnp.float32), targets2d, alpha_row)
    return out[0, 0]


def focal_loss_ref(logits, targets, alpha, gamma=GAMMA):
    p = jax.nn.softmax(logits, axis=1)
    probs = jnp.take_along_axis(p, targets.reshape(-1, 1), axis=1)
    a = alpha[targets].reshape(-1, 1)
    batch_loss = -a * jnp.power(1.0 - probs, gamma) * jnp.log(probs)
    return jnp.mean(batch_loss)


if __name__ == "__main__":
    key = jax.random.PRNGKey(0)
    k1, k2, k3, k4 = jax.random.split(key, 4)

    # Small case matching the module defaults (alpha=ones, gamma=2, size_average=True).
    N, C = 8, 4
    logits = jax.random.normal(k1, (N, C), dtype=jnp.float32)
    targets = jax.random.randint(k2, (N,), 0, C, dtype=jnp.int32)
    loss = jax.block_until_ready(focal_loss(logits, targets))
    ref = focal_loss_ref(logits, targets, jnp.ones((C,), jnp.float32))
    assert jnp.allclose(loss, ref, atol=1e-5, rtol=1e-5), (loss, ref)

    # Larger ragged case exercising multi-step accumulation + final-tile masking + non-trivial alpha.
    N2, C2 = 300, 10
    logits2 = jax.random.normal(k3, (N2, C2), dtype=jnp.float32) * 3.0
    targets2 = jax.random.randint(k4, (N2,), 0, C2, dtype=jnp.int32)
    alpha2 = jnp.linspace(0.5, 1.5, C2).astype(jnp.float32)
    loss2 = jax.block_until_ready(focal_loss(logits2, targets2, alpha2, tile_n_max=128))
    ref2 = focal_loss_ref(logits2, targets2, alpha2)
    assert jnp.allclose(loss2, ref2, atol=1e-5, rtol=1e-5), (loss2, ref2)

    print("KERNEL_OK")
</pallas_src>

<mosaic_0001>
module attributes {stable_mosaic.version = 11 : i64} {
  func.func @focal_loss_kernel(%arg0: i32, %arg1: memref<8x4xf32, #tpu.memory_space<vmem>>, %arg2: memref<8x1xi32, #tpu.memory_space<vmem>>, %arg3: memref<1x4xf32, #tpu.memory_space<vmem>>, %arg4: memref<1x1xf32, #tpu.memory_space<vmem>>, %arg5: memref<1x1xf32, #tpu.memory_space<vmem>>) attributes {dimension_semantics = [#tpu.dimension_semantics<arbitrary>], iteration_bounds = array<i64: 1>, scalar_prefetch = 0 : i64, scratch_operands = 1 : i64, tpu.core_type = #tpu.core_type<tc>, window_params = [{transform_indices = @transform_0, window_bounds = array<i64: 8, 4>}, {transform_indices = @transform_1, window_bounds = array<i64: 8, 1>}, {pipeline_mode = #tpu.pipeline_mode<synchronous>, transform_indices = @transform_2, window_bounds = array<i64: 1, 4>}, {pipeline_mode = #tpu.pipeline_mode<synchronous>, transform_indices = @transform_3, window_bounds = array<i64: 1, 1>}]} {
    %c0_i32 = arith.constant 0 : i32
    %0 = arith.cmpi eq, %arg0, %c0_i32 : i32
    %1 = arith.extui %0 : i1 to i32
    %c0_i32_0 = arith.constant 0 : i32
    %2 = arith.cmpi ne, %1, %c0_i32_0 : i32
    scf.if %2 {
      %cst_20 = arith.constant 0.000000e+00 : f32
      %52 = vector.broadcast %cst_20 : f32 to vector<1x1xf32>
      %c0_21 = arith.constant 0 : index
      %c0_22 = arith.constant 0 : index
      %53 = vector.load %arg5[%c0_21, %c0_22] : memref<1x1xf32, #tpu.memory_space<vmem>>, vector<1x1xf32>
      tpu.vector_store %arg5[%c0_21, %c0_22], %52 {strides = array<i32>} : memref<1x1xf32, #tpu.memory_space<vmem>>, vector<1x1xf32>,
    } else {
    }
    %c0 = arith.constant 0 : index
    %c0_1 = arith.constant 0 : index
    %3 = vector.load %arg1[%c0, %c0_1] : memref<8x4xf32, #tpu.memory_space<vmem>>, vector<8x4xf32>
    %c0_2 = arith.constant 0 : index
    %c0_3 = arith.constant 0 : index
    %4 = vector.load %arg2[%c0_2, %c0_3] : memref<8x1xi32, #tpu.memory_space<vmem>>, vector<8x1xi32>
    %c0_4 = arith.constant 0 : index
    %c0_5 = arith.constant 0 : index
    %5 = vector.load %arg3[%c0_4, %c0_5] : memref<1x4xf32, #tpu.memory_space<vmem>>, vector<1x4xf32>
    %6 = tpu.iota {dimensions = array<i32: 1>} : vector<8x4xi32>
    %7 = vector.broadcast %4 : vector<8x1xi32> to vector<8x4xi32>
    %8 = arith.cmpi eq, %6, %7 : vector<8x4xi32>
    %9 = arith.extui %8 : vector<8x4xi1> to vector<8x4xi32>
    %10 = arith.sitofp %9 : vector<8x4xi32> to vector<8x4xf32>
    %cst = arith.constant dense<0xFF800000> : vector<8xf32>
    %11 = vector.multi_reduction <maximumf>, %3, %cst [1] : vector<8x4xf32> to vector<8xf32>
    %12 = vector.shape_cast %11 : vector<8xf32> to vector<8x1xf32>
    %13 = vector.broadcast %12 : vector<8x1xf32> to vector<8x4xf32>
    %14 = arith.subf %3, %13 : vector<8x4xf32>
    %15 = math.exp %14 : vector<8x4xf32>
    %cst_6 = arith.constant dense<0.000000e+00> : vector<8xf32>
    %16 = vector.multi_reduction <add>, %15, %cst_6 [1] : vector<8x4xf32> to vector<8xf32>
    %17 = vector.shape_cast %16 : vector<8xf32> to vector<8x1xf32>
    %18 = math.log %17 : vector<8x1xf32>
    %19 = arith.addf %12, %18 : vector<8x1xf32>
    %20 = arith.mulf %3, %10 : vector<8x4xf32>
    %cst_7 = arith.constant dense<0.000000e+00> : vector<8xf32>
    %21 = vector.multi_reduction <add>, %20, %cst_7 [1] : vector<8x4xf32> to vector<8xf32>
    %22 = vector.shape_cast %21 : vector<8xf32> to vector<8x1xf32>
    %23 = arith.subf %22, %19 : vector<8x1xf32>
    %24 = math.exp %23 : vector<8x1xf32>
    %25 = vector.broadcast %5 : vector<1x4xf32> to vector<8x4xf32>
    %26 = arith.mulf %25, %10 : vector<8x4xf32>
    %cst_8 = arith.constant dense<0.000000e+00> : vector<8xf32>
    %27 = vector.multi_reduction <add>, %26, %cst_8 [1] : vector<8x4xf32> to vector<8xf32>
    %28 = vector.shape_cast %27 : vector<8xf32> to vector<8x1xf32>
    %cst_9 = arith.constant 1.000000e+00 : f32
    %29 = vector.broadcast %cst_9 : f32 to vector<8x1xf32>
    %30 = arith.subf %29, %24 : vector<8x1xf32>
    %31 = arith.mulf %30, %30 : vector<8x1xf32>
    %cst_10 = arith.constant 0.000000e+00 : f32
    %32 = vector.broadcast %cst_10 : f32 to vector<8x1xf32>
    %33 = arith.subf %32, %28 : vector<8x1xf32>
    %34 = arith.mulf %33, %31 : vector<8x1xf32>
    %35 = arith.mulf %34, %23 : vector<8x1xf32>
    %36 = tpu.iota {dimensions = array<i32: 0>} : vector<8x1xi32>
    %c8_i32 = arith.constant 8 : i32
    %37 = arith.muli %arg0, %c8_i32 : i32
    %38 = vector.broadcast %37 : i32 to vector<8x1xi32>
    %39 = arith.addi %36, %38 : vector<8x1xi32>
    %c8_i32_11 = arith.constant 8 : i32
    %40 = vector.broadcast %c8_i32_11 : i32 to vector<8x1xi32>
    %41 = arith.cmpi slt, %39, %40 : vector<8x1xi32>
    %cst_12 = arith.constant 0.000000e+00 : f32
    %42 = vector.broadcast %cst_12 : f32 to vector<8x1xf32>
    %43 = arith.select %41, %35, %42 : vector<8x1xi1>, vector<8x1xf32>
    %c0_13 = arith.constant 0 : index
    %c0_14 = arith.constant 0 : index
    %44 = vector.load %arg5[%c0_13, %c0_14] : memref<1x1xf32, #tpu.memory_space<vmem>>, vector<1x1xf32>
    %cst_15 = arith.constant dense<0.000000e+00> : vector<1xf32>
    %45 = vector.multi_reduction <add>, %43, %cst_15 [0] : vector<8x1xf32> to vector<1xf32>
    %46 = vector.shape_cast %45 : vector<1xf32> to vector<1x1xf32>
    %47 = arith.addf %44, %46 : vector<1x1xf32>
    %c0_16 = arith.constant 0 : index
    %c0_17 = arith.constant 0 : index
    %48 = vector.load %arg5[%c0_16, %c0_17] : memref<1x1xf32, #tpu.memory_space<vmem>>, vector<1x1xf32>
    tpu.vector_store %arg5[%c0_16, %c0_17], %47 {strides = array<i32>} : memref<1x1xf32, #tpu.memory_space<vmem>>, vector<1x1xf32>,
    %c0_i32_18 = arith.constant 0 : i32
    %49 = arith.cmpi eq, %arg0, %c0_i32_18 : i32
    %50 = arith.extui %49 : i1 to i32
    %c0_i32_19 = arith.constant 0 : i32
    %51 = arith.cmpi ne, %50, %c0_i32_19 : i32
    scf.if %51 {
      %c0_20 = arith.constant 0 : index
      %c0_21 = arith.constant 0 : index
      %52 = vector.load %arg5[%c0_20, %c0_21] : memref<1x1xf32, #tpu.memory_space<vmem>>, vector<1x1xf32>
      %cst_22 = arith.constant 8.000000e+00 : f32
      %53 = vector.broadcast %cst_22 : f32 to vector<1x1xf32>
      %54 = arith.divf %52, %53 : vector<1x1xf32>
      %c0_23 = arith.constant 0 : index
      %c0_24 = arith.constant 0 : index
      %55 = vector.load %arg4[%c0_23, %c0_24] : memref<1x1xf32, #tpu.memory_space<vmem>>, vector<1x1xf32>
      tpu.vector_store %arg4[%c0_23, %c0_24], %54 {strides = array<i32>} : memref<1x1xf32, #tpu.memory_space<vmem>>, vector<1x1xf32>,
    } else {
    }
    return
  }
  func.func @transform_0(%arg0: i32) -> (i32, i32) {
    %c0_i32 = arith.constant 0 : i32
    %c0_i32_0 = arith.constant 0 : i32
    return %arg0, %c0_i32 : i32, i32
  }
  func.func @transform_1(%arg0: i32) -> (i32, i32) {
    %c0_i32 = arith.constant 0 : i32
    %c0_i32_0 = arith.constant 0 : i32
    return %arg0, %c0_i32 : i32, i32
  }
  func.func @transform_2(%arg0: i32) -> (i32, i32) {
    %c0_i32 = arith.constant 0 : i32
    %c0_i32_0 = arith.constant 0 : i32
    %c0_i32_1 = arith.constant 0 : i32
    return %c0_i32, %c0_i32_0 : i32, i32
  }
  func.func @transform_3(%arg0: i32) -> (i32, i32) {
    %c0_i32 = arith.constant 0 : i32
    %c0_i32_0 = arith.constant 0 : i32
    %c0_i32_1 = arith.constant 0 : i32
    return %c0_i32, %c0_i32_0 : i32, i32
  }
}

</mosaic_0001>

<bundles_post_ra>
// kernel: tpu_custom_call.1
= control target key start
LH: loop header
LB: loop body
LE: loop exit
PB: predicated region body
PF: predicated region fallthrough
CT: control target
= control target key end

     0   :  { %vm32_vm0 = vcmask 31744   ;;  %s181_s0 = inlined_call_operand.vmem [shape: f32[8,4], index: 0, kind: input, shape index: {}]   ;;  %s182_s1 = inlined_call_operand.vmem [shape: s32[8,1], index: 1, kind: input, shape index: {}]   ;;  %s183_s2 = inlined_call_operand.vmem [shape: f32[1,4], index: 2, kind: input, shape index: {}]   ;;  %s184_s3 = inlined_call_operand.hbm [shape: f32[1,1], index: 3, kind: output, shape index: {}]  }
   0x1   :  { %v21_v0 = vld [vmem:[%s181_s0] sm:$0xff] }
   0x2   :  { %8 = vsyncpa [#allocation4], 0  ;;  %v33_v1 = vsel %vm32_vm0, %v21_v0, -inf  ;;  %v139_v2 = vmov 0   ;;  %v22_v3 = vld [vmem:[%s182_s1] sm:$0xff]  ;;  %vm19_vm1 = vcmask 0   ;;  %v24_v8 = vlaneseq }
   0x3   :  { %110 = vset.pattern.permute.xlu0 %v139_v2  ;;  %v140_v4 = vmov 0.0   ;;  %v106_v14 = vld [vmem:[%s183_s2] ss:$0 sm:$0xff]  ;;  %s141_s1 = smov [#allocation3]  }
   0x4   :  { %34 = vmax.xlane.f32.xlu0 %v33_v1  ;;  %20 = vst.msk [vmem:[#allocation2] sm:$0x1] %vm19_vm1, %v140_v4  ;;  %v25_v9 = vand.u32 127, %v24_v8  ;;  %s97_s2 = sshll.u32 %s141_s1, 4  ;;  %s98_s2 = int_to_ptr.vmem [resolvable:$true] %s97_s2 }
   0x5   :  { %s117_s17 = scalar_lea.vmem %s98_s2, 16  ;;  %s121_s18 = scalar_lea.vmem %s98_s2, 32 }
   0x6   :  { %p118_p0 = scmp.ne.s32.totalorder %s98_s2, %s117_s17  ;;  %p122_p1 = scmp.lt.s32.totalorder %s98_s2, %s98_s2 }
   0x7   :  { %p123_p2 = scmp.lt.s32.totalorder %s121_s18, %s117_s17 }
   0x9   :  { %p124_p3 = por %p123_p2, %p122_p1 }
   0xb   :  { %v74_v38 = vld [vmem:[#allocation2] sm:$0x1]  ;;  %p125_p4 = pnand %p124_p3, %p118_p0 }
  0x1a   :  { %27 = vperm.xlu0 %110, %v22_v3  }
  0x8d   :  { %v35_v5 = vpop.xlane.xlu0 %34 }
  0x8e   :  { %v36_v6 = vsub.f32 %v21_v0, %v35_v5 }
  0x90   :  { %v37_v7 = vmul.f32 1.442695, %v36_v6 }
  0x92   :  { %111 = vpow2.f32 %v37_v7 }
  0x95   :  { %v28_v10 = vpop.permute.xlu0 %27 }
  0x96   :  { %vm29_vm2 = vcmp.eq.s32.totalorder %v25_v9, %v28_v10 }
  0x97   :  { %v105_v11 = vsel %vm29_vm2, 1.0, %v140_v4 }
  0x98   :  { %v45_v12 = vmul.f32 %v105_v11, %v21_v0  ;;  %v58_v17 = vmul.f32 %v106_v14, %v105_v11 }
  0x9a   :  { %v46_v16 = vsel %vm32_vm0, %v45_v12, 0.0  ;;  %v59_v18 = vsel %vm32_vm0, %v58_v17, 0.0 }
  0x9f   :  { %v112_v13 = vpop.eup %111 }
  0xa0   :  { %v39_v15 = vsel %vm32_vm0, %v112_v13, 0.0 }
  0xa1   :  { %40 = vadd.xlane.f32.xlu1 %v39_v15 }
  0xa5   :  { %47 = vadd.xlane.f32.xlu1 %v46_v16 }
  0xa9   :  { %60 = vadd.xlane.f32.xlu1 %v59_v18 }
 0x12a   :  { %v41_v19 = vpop.xlane.xlu1 %40 }
 0x12b   :  { %113 = vlog2.f32 %v41_v19 }
 0x12e   :  { %v48_v23 = vpop.xlane.xlu1 %47 }
 0x132   :  { %v61_v27 = vpop.xlane.xlu1 %60 }
 0x133   :  { %v64_v30 = vsub.f32 0.0, %v61_v27 }
 0x138   :  { %v114_v20 = vpop.eup %113 }
 0x139   :  { %v43_v21 = vmul.f32 0.6931472, %v114_v20 }
 0x13b   :  { %v44_v22 = vadd.f32 %v43_v21, %v35_v5 }
 0x13d   :  { %v49_v24 = vsub.f32 %v48_v23, %v44_v22 }
 0x13f   :  { %v50_v25 = vmul.f32 1.442695, %v49_v24 }
 0x141   :  { %115 = vpow2.f32 %v50_v25 }
 0x14e   :  { %v116_v26 = vpop.eup %115 }
 0x14f   :  { %v62_v28 = vsub.f32 1.0, %v116_v26 }
 0x151   :  { %v63_v29 = vmul.f32 %v62_v28, %v62_v28 }
 0x153   :  { %v65_v31 = vmul.f32 %v64_v30, %v63_v29 }
 0x155   :  { %v66_v32 = vmul.f32 %v65_v31, %v49_v24 }
 0x157   :  { %v75_v33 = vrot.slane %v66_v32, 4 }
 0x159   :  { %v76_v34 = vadd.f32 %v75_v33, %v66_v32 }
 0x15b   :  { %v77_v35 = vrot.slane %v76_v34, 2 }
 0x15d   :  { %v78_v36 = vadd.f32 %v77_v35, %v76_v34 }
 0x15f   :  { %v79_v37 = vrot.slane %v78_v36, 1 }
 0x161   :  { %v80_v39 = vadd.f32 %v79_v37, %v78_v36 }
 0x163   :  { %v81_v40 = vadd.f32 %v80_v39, %v74_v38 }
 0x165   :  { %83 = vst.msk [vmem:[#allocation2] sm:$0x1] %vm19_vm1, %v81_v40 }
 0x16c   :  { %v87_v41 = vld [vmem:[#allocation2] sm:$0x1] }
 0x16d   :  { %v89_v42 = vmul.f32 0.125, %v87_v41 }
 0x16f   :  { %90 = vst.msk [vmem:[#allocation3] sm:$0x1] %vm19_vm1, %v89_v42 }
 0x170   :  { %128 = shalt.err (!%p125_p4)
}
 0x171   :  { %100 = dma.vmem_to_hbm [thread:$0]  %s98_s2, 16, %s184_s3, [#allocation4]  }
 0x172   :  { %137 = dma.done.wait [#allocation4], 16  }
 0x173   :  { %138 = vsyncadd [#allocation4], 4294967280 }
 0x174   :  { %104 = vsyncpa [#allocation4], 1 }

</bundles_post_ra>
